<compile_context>
chip_gen: v5e
topology: v5e:2x2
jax: 0.10.0
libtpu: 0.0.40
codegen_flags: <defaults>
</compile_context>

<pallas_src>
import functools
import math

import jax
import jax.numpy as jnp
from jax import lax
from jax.experimental import pallas as pl
from jax.experimental.pallas import tpu as pltpu


def _apply_act(y, act):
    """Activation epilogue on an f32 tile."""
    if act == "mish":
        # mish(y) = y * tanh(softplus(y)).  With v = exp(-|y|):
        #   y >= 0: tanh(softplus(y)) = (1 + 2v) / (1 + 2v + 2v^2)
        #   y <  0: tanh(softplus(y)) = v (v + 2) / (v^2 + 2v + 2)
        # -> one transcendental + one divide instead of exp + log1p + tanh.
        v = jnp.exp(-jnp.abs(y))
        num = jnp.where(y >= 0, 1.0 + 2.0 * v, v * (v + 2.0))
        den = jnp.where(y >= 0, 1.0 + 2.0 * v + 2.0 * v * v,
                        v * v + 2.0 * v + 2.0)
        return y * (num / den)
    elif act == "relu":
        return jnp.maximum(y, 0.0)
    raise ValueError(f"unknown act: {act}")


# -------------- stage 1: pointwise (1x1) conv + bias + activation ------------


def _pw_conv_act_kernel(x_ref, w_ref, b_ref, o_ref, *, act):
    # x_ref: (1, Cin, TILE_P)   w_ref: (C1, Cin)   b_ref: (C1, 1)
    x = x_ref[0].astype(jnp.float32)
    w = w_ref[...].astype(jnp.float32)
    b = b_ref[...].astype(jnp.float32)
    y = jnp.dot(w, x, preferred_element_type=jnp.float32) + b
    o_ref[0] = _apply_act(y, act).astype(o_ref.dtype)


# ------ stage 2: depthwise KxK conv + bias + activation, fused with concat ----


def _dw_conv_act_concat_kernel(x1p_ref, w_ref, b_ref, o_ref, *,
                               act, K, pad, C1, H, W):
    # x1p_ref: (1, C1, H+2p, W+2p)  spatially pre-padded x1
    # w_ref:   (C1, K, K) depthwise weights      b_ref: (C1, 1, 1)
    # o_ref:   (1, 2*C1, H, W)  [:C1] = x1 passthrough, [C1:] = cheap branch
    xp = x1p_ref[0].astype(jnp.float32)
    x1 = xp[:, pad:pad + H, pad:pad + W]
    o_ref[0, :C1] = x1.astype(o_ref.dtype)

    w = w_ref[...].astype(jnp.float32)
    acc = jnp.zeros((C1, H, W), dtype=jnp.float32)
    for ky in range(K):
        for kx in range(K):
            acc = acc + xp[:, ky:ky + H, kx:kx + W] * w[:, ky:ky + 1, kx:kx + 1]
    acc = acc + b_ref[...].astype(jnp.float32)
    o_ref[0, C1:] = _apply_act(acc, act).astype(o_ref.dtype)


# ------------------------------- wrapper --------------------------------------


def _round_up(a, m):
    return (a + m - 1) // m * m


def _choose_tile_p(P, c_in, c_out, itemsize, budget_bytes=2 << 20):
    """Largest multiple of 128 so the bigger of the in/out blocks ~ budget."""
    per_col = itemsize * max(c_in, c_out)
    max_tp = max(128, (budget_bytes // per_col) // 128 * 128)
    return min(_round_up(P, 128), max_tp)


def ghost_module_forward(x, w1, b1, w2, b2, out_ch, *, act="mish", dw_size=3):
    """GhostModule forward (kernel_size=1, stride=1, ratio=2, ins=False)."""
    N, Cin, H, W = x.shape
    C1 = w1.shape[0]           # init_channels
    C2 = w2.shape[0]           # new_channels
    if C2 != C1:
        raise NotImplementedError("only ratio=2 (new_channels == init_channels)")
    K, pad = dw_size, dw_size // 2
    P = H * W
    dtype = x.dtype

    # ---- stage 1: x1 = act(W1 @ x + b1), tiled over (batch, spatial) ----
    tile_p = _choose_tile_p(P, Cin, C1, jnp.dtype(dtype).itemsize)
    x_flat = x.reshape(N, Cin, P)
    x1_flat = pl.pallas_call(
        functools.partial(_pw_conv_act_kernel, act=act),
        out_shape=jax.ShapeDtypeStruct((N, C1, P), dtype),
        grid_spec=pltpu.PrefetchScalarGridSpec(
            num_scalar_prefetch=0,
            grid=(N, pl.cdiv(P, tile_p)),
            in_specs=[
                pl.BlockSpec((1, Cin, tile_p), lambda n, p: (n, 0, p)),
                pl.BlockSpec((C1, Cin), lambda n, p: (0, 0)),
                pl.BlockSpec((C1, 1), lambda n, p: (0, 0)),
            ],
            out_specs=pl.BlockSpec((1, C1, tile_p), lambda n, p: (n, 0, p)),
        ),
        compiler_params=pltpu.CompilerParams(
            dimension_semantics=("parallel", "parallel")),
    )(x_flat, w1, b1.reshape(C1, 1))
    x1 = x1_flat.reshape(N, C1, H, W)

    # ---- stage 2: out = concat([x1, act(dwconv(x1) + b2)], channel) ----
    # Spatial halo pad of x1 only (required by the conv's padding=K//2; small).
    x1p = jnp.pad(x1, ((0, 0), (0, 0), (pad, pad), (pad, pad)))
    out = pl.pallas_call(
        functools.partial(_dw_conv_act_concat_kernel, act=act, K=K, pad=pad,
                          C1=C1, H=H, W=W),
        out_shape=jax.ShapeDtypeStruct((N, 2 * C1, H, W), dtype),
        grid_spec=pltpu.PrefetchScalarGridSpec(
            num_scalar_prefetch=0,
            grid=(N,),
            in_specs=[
                pl.BlockSpec((1, C1, H + 2 * pad, W + 2 * pad),
                             lambda n: (n, 0, 0, 0)),
                pl.BlockSpec((C1, K, K), lambda n: (0, 0, 0)),
                pl.BlockSpec((C1, 1, 1), lambda n: (0, 0, 0)),
            ],
            out_specs=pl.BlockSpec((1, 2 * C1, H, W), lambda n: (n, 0, 0, 0)),
        ),
        compiler_params=pltpu.CompilerParams(
            dimension_semantics=("parallel",)),
    )(x1p, w2, b2.reshape(C1, 1, 1))

    return out[:, :out_ch]


# ------------------------------ pure-JAX ref -----------------------------------


def ghost_module_ref(x, w1, b1, w2, b2, out_ch, *, act="mish", dw_size=3):
    def act_fn(y):
        if act == "mish":
            return y * jnp.tanh(jax.nn.softplus(y))
        return jax.nn.relu(y)

    C1 = w1.shape[0]
    pad = dw_size // 2
    y1 = jnp.einsum("oi,nihw->nohw", w1, x,
                    precision=lax.Precision.HIGHEST) + b1[None, :, None, None]
    x1 = act_fn(y1)
    y2 = lax.conv_general_dilated(
        x1, w2[:, None, :, :], window_strides=(1, 1),
        padding=[(pad, pad), (pad, pad)],
        dimension_numbers=("NCHW", "OIHW", "NCHW"),
        feature_group_count=C1,
        precision=lax.Precision.HIGHEST)
    x2 = act_fn(y2 + b2[None, :, None, None])
    return jnp.concatenate([x1, x2], axis=1)[:, :out_ch]


if __name__ == "__main__":
    key = jax.random.PRNGKey(0)
    k1, k2, k3, k4, k5 = jax.random.split(key, 5)

    N, in_ch, H, W = 2, 4, 16, 16
    out_ch, ratio, dw_size = 8, 2, 3
    init_ch = math.ceil(out_ch / ratio)
    new_ch = init_ch * (ratio - 1)

    x = jax.random.normal(k1, (N, in_ch, H, W), dtype=jnp.float32)
    w1 = jax.random.normal(k2, (init_ch, in_ch), dtype=jnp.float32) * 0.5
    b1 = jax.random.normal(k3, (init_ch,), dtype=jnp.float32) * 0.1
    w2 = jax.random.normal(k4, (new_ch, dw_size, dw_size), dtype=jnp.float32) * 0.3
    b2 = jax.random.normal(k5, (new_ch,), dtype=jnp.float32) * 0.1

    out = ghost_module_forward(x, w1, b1, w2, b2, out_ch,
                               act="mish", dw_size=dw_size)
    jax.block_until_ready(out)

    ref = ghost_module_ref(x, w1, b1, w2, b2, out_ch,
                           act="mish", dw_size=dw_size)
    assert out.shape == (N, out_ch, H, W), out.shape
    max_err = float(jnp.max(jnp.abs(out - ref)))
    assert jnp.allclose(out, ref, atol=1e-3, rtol=1e-3), max_err

    print("KERNEL_OK")
</pallas_src>

<mosaic_0001>
module attributes {stable_mosaic.version = 11 : i64} {
  func.func @_pw_conv_act_kernel(%arg0: i32, %arg1: i32, %arg2: memref<1x4x256xf32, #tpu.memory_space<vmem>>, %arg3: memref<4x4xf32, #tpu.memory_space<vmem>>, %arg4: memref<4x1xf32, #tpu.memory_space<vmem>>, %arg5: memref<1x4x256xf32, #tpu.memory_space<vmem>>) attributes {dimension_semantics = [#tpu.dimension_semantics<parallel>, #tpu.dimension_semantics<parallel>], iteration_bounds = array<i64: 2, 1>, scalar_prefetch = 0 : i64, scratch_operands = 0 : i64, tpu.core_type = #tpu.core_type<tc>, window_params = [{transform_indices = @transform_0, window_bounds = array<i64: 1, 4, 256>}, {pipeline_mode = #tpu.pipeline_mode<synchronous>, transform_indices = @transform_1, window_bounds = array<i64: 4, 4>}, {pipeline_mode = #tpu.pipeline_mode<synchronous>, transform_indices = @transform_2, window_bounds = array<i64: 4, 1>}, {transform_indices = @transform_3, window_bounds = array<i64: 1, 4, 256>}]} {
    %c0 = arith.constant 0 : index
    %c0_0 = arith.constant 0 : index
    %c0_1 = arith.constant 0 : index
    %0 = vector.load %arg2[%c0, %c0_0, %c0_1] : memref<1x4x256xf32, #tpu.memory_space<vmem>>, vector<1x4x256xf32>
    %1 = vector.shape_cast %0 : vector<1x4x256xf32> to vector<4x256xf32>
    %c0_2 = arith.constant 0 : index
    %c0_3 = arith.constant 0 : index
    %2 = vector.load %arg3[%c0_2, %c0_3] : memref<4x4xf32, #tpu.memory_space<vmem>>, vector<4x4xf32>
    %c0_4 = arith.constant 0 : index
    %c0_5 = arith.constant 0 : index
    %3 = vector.load %arg4[%c0_4, %c0_5] : memref<4x1xf32, #tpu.memory_space<vmem>>, vector<4x1xf32>
    %cst = arith.constant dense<0.000000e+00> : vector<4x256xf32>
    %4 = tpu.matmul %2, %1, %cst {dimension_numbers = #tpu.dot_dimension_numbers<[1], [0], [0], [1], [0, 0, 1, 1], [], []>} : vector<4x4xf32>, vector<4x256xf32>, vector<4x256xf32> -> vector<4x256xf32>
    %5 = vector.broadcast %3 : vector<4x1xf32> to vector<4x256xf32>
    %6 = arith.addf %4, %5 : vector<4x256xf32>
    %7 = math.absf %6 : vector<4x256xf32>
    %cst_6 = arith.constant 0.000000e+00 : f32
    %8 = vector.broadcast %cst_6 : f32 to vector<4x256xf32>
    %9 = arith.subf %8, %7 : vector<4x256xf32>
    %10 = math.exp %9 : vector<4x256xf32>
    %cst_7 = arith.constant 0.000000e+00 : f32
    %11 = vector.broadcast %cst_7 : f32 to vector<4x256xf32>
    %12 = arith.cmpf oge, %6, %11 : vector<4x256xf32>
    %cst_8 = arith.constant 2.000000e+00 : f32
    %13 = vector.broadcast %cst_8 : f32 to vector<4x256xf32>
    %14 = arith.mulf %13, %10 : vector<4x256xf32>
    %cst_9 = arith.constant 1.000000e+00 : f32
    %15 = vector.broadcast %cst_9 : f32 to vector<4x256xf32>
    %16 = arith.addf %15, %14 : vector<4x256xf32>
    %cst_10 = arith.constant 2.000000e+00 : f32
    %17 = vector.broadcast %cst_10 : f32 to vector<4x256xf32>
    %18 = arith.addf %10, %17 : vector<4x256xf32>
    %19 = arith.mulf %10, %18 : vector<4x256xf32>
    %20 = arith.select %12, %16, %19 : vector<4x256xi1>, vector<4x256xf32>
    %cst_11 = arith.constant 0.000000e+00 : f32
    %21 = vector.broadcast %cst_11 : f32 to vector<4x256xf32>
    %22 = arith.cmpf oge, %6, %21 : vector<4x256xf32>
    %cst_12 = arith.constant 2.000000e+00 : f32
    %23 = vector.broadcast %cst_12 : f32 to vector<4x256xf32>
    %24 = arith.mulf %23, %10 : vector<4x256xf32>
    %cst_13 = arith.constant 1.000000e+00 : f32
    %25 = vector.broadcast %cst_13 : f32 to vector<4x256xf32>
    %26 = arith.addf %25, %24 : vector<4x256xf32>
    %cst_14 = arith.constant 2.000000e+00 : f32
    %27 = vector.broadcast %cst_14 : f32 to vector<4x256xf32>
    %28 = arith.mulf %27, %10 : vector<4x256xf32>
    %29 = arith.mulf %28, %10 : vector<4x256xf32>
    %30 = arith.addf %26, %29 : vector<4x256xf32>
    %31 = arith.mulf %10, %10 : vector<4x256xf32>
    %cst_15 = arith.constant 2.000000e+00 : f32
    %32 = vector.broadcast %cst_15 : f32 to vector<4x256xf32>
    %33 = arith.mulf %32, %10 : vector<4x256xf32>
    %34 = arith.addf %31, %33 : vector<4x256xf32>
    %cst_16 = arith.constant 2.000000e+00 : f32
    %35 = vector.broadcast %cst_16 : f32 to vector<4x256xf32>
    %36 = arith.addf %34, %35 : vector<4x256xf32>
    %37 = arith.select %22, %30, %36 : vector<4x256xi1>, vector<4x256xf32>
    %38 = arith.divf %20, %37 : vector<4x256xf32>
    %39 = arith.mulf %6, %38 : vector<4x256xf32>
    %c0_17 = arith.constant 0 : index
    %c0_18 = arith.constant 0 : index
    %c0_19 = arith.constant 0 : index
    %40 = vector.load %arg5[%c0_17, %c0_18, %c0_19] : memref<1x4x256xf32, #tpu.memory_space<vmem>>, vector<1x4x256xf32>
    %41 = vector.shape_cast %40 : vector<1x4x256xf32> to vector<4x256xf32>
    %42 = vector.shape_cast %39 : vector<4x256xf32> to vector<1x4x256xf32>
    tpu.vector_store %arg5[%c0_17, %c0_18, %c0_19], %42 {strides = array<i32>} : memref<1x4x256xf32, #tpu.memory_space<vmem>>, vector<1x4x256xf32>,
    return
  }
  func.func @transform_0(%arg0: i32, %arg1: i32) -> (i32, i32, i32) {
    %c0_i32 = arith.constant 0 : i32
    %c0_i32_0 = arith.constant 0 : i32
    return %arg0, %c0_i32, %arg1 : i32, i32, i32
  }
  func.func @transform_1(%arg0: i32, %arg1: i32) -> (i32, i32) {
    %c0_i32 = arith.constant 0 : i32
    %c0_i32_0 = arith.constant 0 : i32
    %c0_i32_1 = arith.constant 0 : i32
    return %c0_i32, %c0_i32_0 : i32, i32
  }
  func.func @transform_2(%arg0: i32, %arg1: i32) -> (i32, i32) {
    %c0_i32 = arith.constant 0 : i32
    %c0_i32_0 = arith.constant 0 : i32
    %c0_i32_1 = arith.constant 0 : i32
    return %c0_i32, %c0_i32_0 : i32, i32
  }
  func.func @transform_3(%arg0: i32, %arg1: i32) -> (i32, i32, i32) {
    %c0_i32 = arith.constant 0 : i32
    %c0_i32_0 = arith.constant 0 : i32
    return %arg0, %c0_i32, %arg1 : i32, i32, i32
  }
}

</mosaic_0001>

<bundles_post_ra>
// kernel: tpu_custom_call.1
= control target key start
LH: loop header
LB: loop body
LE: loop exit
PB: predicated region body
PF: predicated region fallthrough
CT: control target
= control target key end

     0   :  { %8 = vsyncpa [#allocation3], 0  ;;  %s822_s0 = inlined_call_operand.hbm [shape: f32[2,4,256], index: 0, kind: input, shape index: {}]   ;;  %s823_s1 = inlined_call_operand.vmem [shape: f32[4,4], index: 1, kind: input, shape index: {}]   ;;  %s824_s2 = inlined_call_operand.vmem [shape: f32[4,1], index: 2, kind: input, shape index: {}]   ;;  %s825_s3 = inlined_call_operand.hbm [shape: f32[2,4,256], index: 3, kind: output, shape index: {}]  }
   0x1   :  { %10 = vsyncpa [#allocation3 + $0x1], 0 }
   0x2   :  { %11 = vsyncpa [#allocation4], 0 }
   0x3   :  { %13 = vsyncpa [#allocation4 + $0x1], 0  ;;  %s671_s12 = smov 0   ;;  %s673_s13 = smov 0  }
   0x4   :  { %s675_s14 = smov 0   ;;  %s677_s15 = smov 0  }
   0x5   :  { %s679_s16 = smov 0   ;;  %s681_s17 = smov 0  }
   0x6 LB: > { %s443_s18 = sadd.s32 4294967295, %s648_s17   ;;  %s444_s19 = sadd.s32 4294967294, %s648_s17   ;;  %s648_s17 = sphi %s681_s17, %s19_s17   ;;  %s644_s16 = sphi %s679_s16, %s834_s16   ;;  %s640_s15 = sphi %s677_s15, %s833_s15   ;;  %s636_s14 = sphi %s675_s14, %s832_s14   ;;  %s632_s13 = sphi %s673_s13, %s831_s13   ;;  %s628_s12 = sphi %s671_s12, %s830_s12  }
   0x7   : > { %s31_s20 = sadd.s32 1, %s644_s16  ;;  %s40_s21 = sadd.s32 1, %s636_s14 }
   0x8   : > { %p33_p0 = scmp.ge.s32.totalorder %s31_s20, 2  ;;  %p47_p1 = scmp.ne.s32.totalorder %s636_s14, %s632_s13 }
   0x9   : > { %p48_p2 = scmp.eq.s32.totalorder %s648_s17, 0  ;;  %p53_p3 = scmp.ne.s32.totalorder %s632_s13, %s628_s12 }
   0xa   : > { %s836_s20 = smov (%p33_p0, %s31_s20), 0  ;;  %p54_p5 = scmp.eq.s32.totalorder %s443_s18, 0 }
   0xb   : > { %p712_p4 = por %p48_p2, %p47_p1  ;;  %s35_s23 = ssub.s32 %s644_s16, %s836_s20 }
   0xc   : > { %p121_p6 = scmp.eq.s32.totalorder %s443_s18, 1  ;;  %p38_p7 = scmp.eq.s32.totalorder %s35_s23, 0 }
   0xd   : > { %p718_p8 = por %p54_p5, %p53_p3  ;;  %p127_p10 = scmp.eq.s32.totalorder %s444_s19, 1 }
   0xe   : > { %p722_p9 = por %p121_p6, %p47_p1  ;;  %p446_p12 = scmp.ge.s32.totalorder %s648_s17, 2 }
   0xf   : > { %s727_s26 = scalar_select %p38_p7, %s636_s14, %s40_s21  }
  0x10   : > { %p729_p11 = por %p127_p10, %p53_p3  ;;  %p476_p13 = scmp.lt.s32.totalorder %s648_s17, 2 }
  0x11   : > { %s153_s28 = sand.u32 1, %s636_s14   ;;  %s462_s30 = sshll.u32 %s644_s16, 3 }
  0x12   : > { %s447_s29 = sshll.u32 %s153_s28, 3  ;;  %s164_s6 = scalar_lea.hbm %s822_s0, %s462_s30 }
  0x13   : > { %s157_s7 = scalar_lea.vmem [#allocation2], %s447_s29  ;;  %s166_s9 = sshll.u32 %s164_s6, 4  ;;  %s167_s9 = int_to_ptr.hbm [resolvable:$true] %s166_s9 }
  0x14   : > { %s168_s8 = sshll.u32 %s157_s7, 4  ;;  %p469_p0 = pnand %p476_p13, %p712_p4  ;;  %s169_s8 = int_to_ptr.vmem [resolvable:$true] %s168_s8 }
  0x15   : > { %p450_p1 = scmp.ge.s32.totalorder %s648_s17, 1  ;;  %p173_p2 = scmp.lt.s32.totalorder %s648_s17, 3 }
  0x16   : > { %s154_s10 = scalar_lea.sflag [#allocation3], %s153_s28 }
  0x17   : > { %471 = dma.hbm_to_vmem [thread:$0]  (!%p469_p0), %s167_s9, 128, %s169_s8, %s154_s10  }
  0x18   : > { %p174_p3 = pnand %p450_p1, %p173_p2 }
  0x19   : > { %s745_s11 = sand.u32 (!%p174_p3), 1, %s632_s13  }
  0x1a   : > { %177 = sbr.rel (%p174_p3) target bundleno = 218 (0xda), region = 32  ;;  %s451_s18 = sshll.u32 (!%p174_p3), %s745_s11, 3 }
  0x1b   : > { %s180_s19 = scalar_lea.sflag (!%p174_p3), [#allocation3], %s745_s11  ;;  %s183_s21 = scalar_lea.vmem (!%p174_p3), [#allocation2], %s451_s18 }
  0x1f   : > { %619 = dma.done.wait (%p718_p8), %s180_s19, 128  }
  0x20   : > { %621 = vsyncadd (%p718_p8), %s180_s19, 4294967168  ;;  %v650_v0 = vmov 0   ;;  %v209_v1 = vld [vmem:[%s183_s21] sm:$0xff]  ;;  %v211_v2 = vld [vmem:[%s824_s2] sm:$0xf]  ;;  %vm225_vm0 = vcmask 1043456  }
  0x21   : > { %527 = vset.pattern.permute.xlu0 %v650_v0  ;;  %218 = vst [vmem:[#allocation1] ss:$2 sm:$0xff] %v209_v1  ;;  %v210_v3 = vld [vmem:[%s823_s1] sm:$0xf]  ;;  %vm221_vm1 = vcmask 31744   ;;  %s463_s24 = sshll.u32 %s640_s15, 3 }
  0x22   : > { %214 = vperm.xlu0 %527, %v211_v2   ;;  %s354_s5 = scalar_lea.hbm %s825_s3, %s463_s24  ;;  %s206_s15 = scalar_lea.vmem [#allocation5], %s451_s18 }
  0x23   : > { %s356_s6 = sshll.u32 %s206_s15, 4  ;;  %s358_s7 = sshll.u32 %s354_s5, 4  ;;  %s357_s6 = int_to_ptr.vmem [resolvable:$true] %s356_s6  ;;  %s359_s7 = int_to_ptr.hbm [resolvable:$true] %s358_s7 }
  0x24   : > { %s341_s8 = scalar_lea.sflag [#allocation4], %s745_s11  ;;  %s580_s9 = sshra.s32 %s359_s7, 4  ;;  %s581_s9 = int_to_ptr.hbm [resolvable:$true] %s580_s9 }
  0x25   : > { %s582_s10 = scalar_lea.hbm %s581_s9, 8  ;;  %s586_s21 = scalar_lea.hbm %s825_s3, 16 }
  0x26   : > { %p583_p4 = scmp.ne.s32.totalorder %s581_s9, %s582_s10  ;;  %p587_p7 = scmp.lt.s32.totalorder %s581_s9, %s825_s3 }
  0x27   : > { %p588_p8 = scmp.lt.s32.totalorder %s586_s21, %s582_s10 }
  0x28   : > { %v219_v4 = vld.sshfl [vmem:[#allocation1] sm:$0xff pattern:$0x75316420]  ;;  %v220_v5 = vld.sshfl [vmem:[#allocation1 + $0x8] sm:$0xff pattern:$0x75316420]  ;;  %p584_p5 = pnand %p583_p4, %p722_p9 }
  0x29   : > { %453 = vmatpush.msk.msra.mxu0 %vm225_vm0, %v219_v4  ;;  %455 = vmatpush.msk.msra.mxu1 %vm225_vm0, %v220_v5  ;;  %p589_p10 = por %p588_p8, %p587_p7 }
  0x2a   : > { %454 = vmatmul.msk.f32.vlgmr.msra.gmra.mxu0 %vm221_vm1, %v210_v3  ;;  %456 = vmatmul.msk.f32.vlgmr.msra.gmra.mxu1 %vm221_vm1, %v210_v3  ;;  %p585_p6 = pneg %p584_p5 }
  0x2c   : > { %p590_p13 = pnand %p589_p10, %p585_p6 }
  0x94   : > { %v215_v6 = vpop.permute.xlu0 %214 }
  0xa7   : > { %v247_v7 = vpop.f32.mrf.mxu0  ;;  %v267_v8 = vpop.f32.mrf.mxu1 }
  0xa8   : > { %v763_v9 = vadd.f32 %v247_v7, %v215_v6  ;;  %v765_v10 = vadd.f32 %v267_v8, %v215_v6 }
  0xaa   : > { %v270_v11 = vand.u32 2147483647, %v763_v9  ;;  %v271_v12 = vand.u32 2147483647, %v765_v10  ;;  %vm278_vm2 = vcmp.ge.f32.partialorder %v763_v9, 0.0  ;;  %vm279_vm3 = vcmp.ge.f32.partialorder %v765_v10, 0.0 }
  0xac   : > { %v272_v13 = vsub.f32 0.0, %v270_v11  ;;  %v273_v14 = vsub.f32 0.0, %v271_v12 }
  0xae   : > { %v274_v15 = vmul.f32 1.442695, %v272_v13  ;;  %v276_v16 = vmul.f32 1.442695, %v273_v14 }
  0xb0   : > { %528 = vpow2.f32 %v274_v15 }
  0xb1   : > { %530 = vpow2.f32 %v276_v16 }
  0xb6   : > { %v529_v17 = vpop.eup %528 }
  0xb7   : > { %v531_v18 = vpop.eup %530  ;;  %v280_v19 = vmul.f32 2.0, %v529_v17  ;;  %v294_v20 = vmul.f32 %v529_v17, %v529_v17  ;;  %v284_v40 = vadd.f32 2.0, %v529_v17 }
  0xb8   : > { %v281_v21 = vmul.f32 2.0, %v531_v18  ;;  %v295_v22 = vmul.f32 %v531_v18, %v531_v18  ;;  %v285_v42 = vadd.f32 2.0, %v531_v18 }
  0xb9   : > { %v282_v23 = vadd.f32 1.0, %v280_v19  ;;  %v290_v24 = vmul.f32 %v529_v17, %v280_v19  ;;  %v296_v25 = vadd.f32 %v294_v20, %v280_v19  ;;  %v286_v50 = vmul.f32 %v529_v17, %v284_v40 }
  0xba   : > { %v283_v26 = vadd.f32 1.0, %v281_v21  ;;  %v291_v27 = vmul.f32 %v531_v18, %v281_v21  ;;  %v297_v28 = vadd.f32 %v295_v22, %v281_v21  ;;  %v287_v52 = vmul.f32 %v531_v18, %v285_v42 }
  0xbb   : > { %v292_v29 = vadd.f32 %v290_v24, %v282_v23  ;;  %v298_v30 = vadd.f32 2.0, %v296_v25  ;;  %v288_v58 = vsel %vm278_vm2, %v282_v23, %v286_v50 }
  0xbc   : > { %v293_v31 = vadd.f32 %v291_v27, %v283_v26  ;;  %v299_v32 = vadd.f32 2.0, %v297_v28  ;;  %v289_v59 = vsel %vm279_vm3, %v283_v26, %v287_v52 }
  0xbd   : > { %v300_v33 = vsel %vm278_vm2, %v292_v29, %v298_v30 }
  0xbe   : > { %532 = vrcp.f32 %v300_v33  ;;  %v301_v34 = vsel %vm279_vm3, %v293_v31, %v299_v32  ;;  %v313_v41 = vand.u32 2147483648, %v300_v33  ;;  %v311_v44 = vand.u32 2147483647, %v300_v33 }
  0xbf   : > { %534 = vrcp.f32 %v301_v34  ;;  %vm307_vm5 = vweird.f32 %v300_v33  ;;  %v328_v46 = vand.u32 2147483648, %v301_v34  ;;  %v326_v49 = vand.u32 2147483647, %v301_v34 }
  0xc0   : > { %v314_v51 = vor.u32 1.1754944e-38, %v313_v41  ;;  %vm312_vm8 = vcmp.eq.f32.partialorder %v311_v44, 8.507059e+37  ;;  %vm322_vm9 = vweird.f32 %v301_v34 }
  0xc1   : > { %v329_v56 = vor.u32 1.1754944e-38, %v328_v46  ;;  %vm327_vm11 = vcmp.eq.f32.partialorder %v326_v49, 8.507059e+37 }
  0xc4   : > { %v533_v35 = vpop.eup %532 }
  0xc5   : > { %v303_v36 = vmul.f32 %v533_v35, %v300_v33  ;;  %v535_v37 = vpop.eup %534  ;;  %vm308_vm4 = vweird.f32 %v533_v35 }
  0xc6   : > { %v318_v39 = vmul.f32 %v535_v37, %v301_v34  ;;  %vm323_vm6 = vweird.f32 %v535_v37  ;;  %vm309_vm7 = vmor %vm307_vm5, %vm308_vm4 }
  0xc7   : > { %v304_v38 = vsub.f32 1.0, %v303_v36  ;;  %vm324_vm10 = vmor %vm322_vm9, %vm323_vm6 }
  0xc8   : > { %v319_v45 = vsub.f32 1.0, %v318_v39 }
  0xc9   : > { %v305_v43 = vmul.f32 %v533_v35, %v304_v38 }
  0xca   : > { %v320_v48 = vmul.f32 %v535_v37, %v319_v45 }
  0xcb   : > { %v306_v47 = vadd.f32 %v533_v35, %v305_v43 }
  0xcc   : > { %v321_v54 = vadd.f32 %v535_v37, %v320_v48 }
  0xcd   : > { %v310_v53 = vsel %vm309_vm7, %v533_v35, %v306_v47 }
  0xce   : > { %v315_v55 = vsel %vm312_vm8, %v314_v51, %v310_v53  ;;  %v325_v57 = vsel %vm324_vm10, %v535_v37, %v321_v54 }
  0xcf   : > { %v330_v60 = vsel %vm327_vm11, %v329_v56, %v325_v57  ;;  %v316_v61 = vmul.f32 %v315_v55, %v288_v58 }
  0xd0   : > { %v331_v62 = vmul.f32 %v330_v60, %v289_v59 }
  0xd1   : > { %v332_v0 = vmul.f32 %v316_v61, %v763_v9 }
  0xd2   : > { %v333_v63 = vmul.f32 %v331_v62, %v765_v10 }
  0xd4   : > { %v336_v1 = vrot.slane %v333_v63, 4 }
  0xd6   : > { %v337_v2 = vsel %vm225_vm0, %v332_v0, %v336_v1 }
  0xd7   : > { %339 = vst [vmem:[%s206_s15] sm:$0xff] %v337_v2 }
  0xd8   : > { %593 = shalt.err (!%p590_p13)
}
  0xd9   : > { %466 = dma.vmem_to_hbm [thread:$0]  (%p722_p9), %s357_s6, 128, %s359_s7, %s341_s8  }
  0xda PF: > { %s370_s11 = sand.u32 1, %s628_s12   ;;  %p473_p0 = pnand %p446_p12, %p729_p11 }
  0xdb   : > { %s371_s28 = scalar_lea.sflag [#allocation4], %s370_s11 }
  0xdc   : > { %p474_p1 = pneg %p473_p0 }
  0xde   : > { %623 = dma.done.wait (%p474_p1), %s371_s28, 128  }
  0xdf   : > { %625 = vsyncadd (%p474_p1), %s371_s28, 4294967168  ;;  %s19_s17 = sadd.s32 1, %s648_s17   ;;  %s830_s12 = smov %s632_s13 }
  0xe0   : > { %p16_p2 = scmp.ge.s32.totalorder %s19_s17, 4   ;;  %s831_s13 = smov %s636_s14 }
  0xe1   : > { %s832_s14 = smov %s727_s26  ;;  %s833_s15 = smov %s644_s16 }
  0xe2   : > { %s834_s16 = smov %s836_s20  ;;  %18 = sbr.rel (!%p16_p2) target bundleno = 6 (0x6), region = 77 }
  0xe7   :  { %377 = vsyncpa [#allocation3], 1 }
  0xe8   :  { %379 = vsyncpa [#allocation3 + $0x1], 1 }
  0xe9   :  { %380 = vsyncpa [#allocation4], 1 }
  0xea   :  { %382 = vsyncpa [#allocation4 + $0x1], 1 }

</bundles_post_ra>
